<compile_context>
chip_gen: v5e
topology: v5e:2x2
jax: 0.10.0
libtpu: 0.0.40
codegen_flags: <defaults>
</compile_context>

<pallas_src>
import math

import jax
import jax.numpy as jnp
from jax.experimental import pallas as pl
from jax.experimental.pallas import tpu as pltpu


# ----------------------------------------------------------------------------
# Single fused Pallas kernel: min + sin + conv-as-matmul (+ bias)
# ----------------------------------------------------------------------------
def _fused_kernel(a_ref, b_ref, w_ref, bias_ref, sin_ref, conv_ref):
    m = jnp.minimum(a_ref[...], b_ref[...])                     # (Mp, K)
    sin_ref[...] = jnp.sin(m)
    conv_ref[...] = (
        jnp.dot(m, w_ref[...], preferred_element_type=jnp.float32) + bias_ref[...]
    )


def fused_min_sin_conv(a_rows, b_rows, wm, bias_row):
    Mp, K = a_rows.shape
    _, Np = wm.shape

    def full(shape):
        return pl.BlockSpec(shape, lambda i: (0,) * len(shape))

    return pl.pallas_call(
        _fused_kernel,
        grid=(1,),
        in_specs=[full((Mp, K)), full((Mp, K)), full((K, Np)), full((1, Np))],
        out_specs=[full((Mp, K)), full((Mp, Np))],
        out_shape=(
            jax.ShapeDtypeStruct((Mp, K), jnp.float32),
            jax.ShapeDtypeStruct((Mp, Np), jnp.float32),
        ),
        compiler_params=pltpu.CompilerParams(dimension_semantics=("arbitrary",)),
    )(a_rows, b_rows, wm, bias_row)


# ----------------------------------------------------------------------------
# Glue: F.interpolate(mode='linear', size=3, align_corners=False)
# (3-element gather; tiny, kept as plain JAX)
# ----------------------------------------------------------------------------
def linear_interp_1d(x, out_size):
    L = x.shape[-1]
    scale = L / out_size
    pos = (jnp.arange(out_size, dtype=jnp.float32) + 0.5) * scale - 0.5
    pos = jnp.clip(pos, 0.0, L - 1)
    i0 = jnp.floor(pos).astype(jnp.int32)
    i1 = jnp.minimum(i0 + 1, L - 1)
    frac = pos - i0.astype(jnp.float32)
    return x[..., i0] * (1.0 - frac) + x[..., i1] * frac


# ----------------------------------------------------------------------------
# Forward pass equivalent to M.forward
# ----------------------------------------------------------------------------
def forward(x0, x1, weight, bias):
    PH, PW = 14, 14
    OC, _, KH, KW = weight.shape                                # (33, 2, 30, 1)

    interp = linear_interp_1d(x0, 3)

    # broadcasting semantics of torch.min(4-D activation, 3-D interp)
    bshape = jnp.broadcast_shapes(x1.shape, interp.shape)
    xa = jnp.broadcast_to(x1, bshape).astype(jnp.float32)
    xb = jnp.broadcast_to(interp, bshape).astype(jnp.float32)

    B, IC, H, W = bshape
    OH = H + 2 * PH - KH + 1
    OW = W + 2 * PW - KW + 1

    # ---- lane-dense operands for the single fused kernel ----
    # rows = (n, w): with KW == 1 only these W columns ever touch real input
    # cols = (ic, h): the contraction
    M, K = B * W, IC * H
    Mp = 8 * ((M + 7) // 8)

    def to_rows(t):
        r = t.transpose(0, 3, 1, 2).reshape(M, K)               # (n, w, ic, h)
        return jnp.pad(r, ((0, Mp - M), (0, 0)))

    a_rows = to_rows(xa)
    b_rows = to_rows(xb)

    # ---- fold the H convolution into the weight (no activation im2col) ----
    oh_idx = jnp.arange(OH)
    h_idx = jnp.arange(H)
    kh = h_idx[None, :] + PH - oh_idx[:, None]                  # (OH, H)
    inside = (kh >= 0) & (kh < KH)
    wg = weight[:, :, :, 0]                                     # (OC, IC, KH)
    wm = wg[:, :, jnp.clip(kh, 0, KH - 1)]                      # (OC, IC, OH, H)
    wm = jnp.where(inside[None, None], wm, 0.0)
    wm = wm.transpose(1, 3, 0, 2).reshape(K, OC * OH)           # ((ic,h), (oc,oh))
    N = OC * OH
    Np = 128 * ((N + 127) // 128)                               # 495 -> 512 lanes
    wm = jnp.pad(wm, ((0, 0), (0, Np - N))).astype(jnp.float32)
    bias_row = jnp.pad(jnp.repeat(bias, OH), (0, Np - N))
    bias_row = bias_row.reshape(1, Np).astype(jnp.float32)

    sin_rows, conv_rows = fused_min_sin_conv(a_rows, b_rows, wm, bias_row)

    # sin back to the original (B, IC, H, W) layout
    sin_out = sin_rows[:M].reshape(B, W, IC, H).transpose(0, 2, 3, 1)

    # conv: real-data columns land at ow in [PW, PW+W); every other output
    # column only ever sees zero padding, i.e. equals the bias.
    valid = conv_rows[:M, :N].reshape(B, W, OC, OH).transpose(0, 2, 3, 1)
    conv = jnp.broadcast_to(
        bias.reshape(1, OC, 1, 1).astype(jnp.float32), (B, OC, OH, OW)
    )
    conv = jax.lax.dynamic_update_slice(conv, valid, (0, 0, 0, PW))
    return sin_out, conv.astype(jnp.float32)                    # .to(torch.float32)


# ----------------------------------------------------------------------------
# Pure-JAX reference (for correctness check only)
# ----------------------------------------------------------------------------
def reference(x0, x1, weight, bias):
    interp = linear_interp_1d(x0, 3)
    min_1 = jnp.minimum(x1, interp)
    sin = jnp.sin(min_1)
    conv = jax.lax.conv_general_dilated(
        min_1, weight, window_strides=(1, 1), padding=((14, 14), (14, 14)),
        dimension_numbers=("NCHW", "OIHW", "NCHW"))
    conv = conv + bias.reshape(1, -1, 1, 1)
    return sin, conv.astype(jnp.float32)


if __name__ == "__main__":
    key = jax.random.PRNGKey(0)
    k0, k1, k2, k3 = jax.random.split(key, 4)

    # args[0]: 3D (N, C, L) for linear interpolate; args[1]: NCHW with C=2 for Conv2d
    x0 = jax.random.normal(k0, (1, 1, 8), dtype=jnp.float32)
    x1 = jax.random.normal(k1, (2, 2, 16, 3), dtype=jnp.float32)

    # deterministic Conv2d(2, 33, (30, 1)) parameters (PyTorch-style uniform bound)
    fan_in = 2 * 30 * 1
    bound = 1.0 / math.sqrt(fan_in)
    weight = jax.random.uniform(
        k2, (33, 2, 30, 1), minval=-bound, maxval=bound, dtype=jnp.float32
    )
    bias = jax.random.uniform(
        k3, (33,), minval=-bound, maxval=bound, dtype=jnp.float32
    )

    sin_out, conv_out = jax.jit(forward)(x0, x1, weight, bias)
    jax.block_until_ready((sin_out, conv_out))

    assert sin_out.shape == (2, 2, 16, 3) and sin_out.dtype == jnp.float32
    assert conv_out.shape == (2, 33, 15, 31) and conv_out.dtype == jnp.float32

    sin_ref, conv_ref = jax.jit(reference)(x0, x1, weight, bias)
    jax.block_until_ready((sin_ref, conv_ref))
    assert jnp.allclose(sin_out, sin_ref, atol=1e-4, rtol=1e-4)
    assert jnp.allclose(conv_out, conv_ref, atol=2e-2, rtol=2e-2)

    print("KERNEL_OK")
</pallas_src>

<mosaic_0001>
module attributes {stable_mosaic.version = 11 : i64} {
  func.func @_fused_kernel(%arg0: i32, %arg1: memref<8x32xf32, #tpu.memory_space<vmem>>, %arg2: memref<8x32xf32, #tpu.memory_space<vmem>>, %arg3: memref<32x512xf32, #tpu.memory_space<vmem>>, %arg4: memref<1x512xf32, #tpu.memory_space<vmem>>, %arg5: memref<8x32xf32, #tpu.memory_space<vmem>>, %arg6: memref<8x512xf32, #tpu.memory_space<vmem>>) attributes {dimension_semantics = [#tpu.dimension_semantics<arbitrary>], iteration_bounds = array<i64: 1>, scalar_prefetch = 0 : i64, scratch_operands = 0 : i64, tpu.core_type = #tpu.core_type<tc>, window_params = [{pipeline_mode = #tpu.pipeline_mode<synchronous>, transform_indices = @transform_0, window_bounds = array<i64: 8, 32>}, {pipeline_mode = #tpu.pipeline_mode<synchronous>, transform_indices = @transform_1, window_bounds = array<i64: 8, 32>}, {pipeline_mode = #tpu.pipeline_mode<synchronous>, transform_indices = @transform_2, window_bounds = array<i64: 32, 512>}, {pipeline_mode = #tpu.pipeline_mode<synchronous>, transform_indices = @transform_3, window_bounds = array<i64: 1, 512>}, {pipeline_mode = #tpu.pipeline_mode<synchronous>, transform_indices = @transform_4, window_bounds = array<i64: 8, 32>}, {pipeline_mode = #tpu.pipeline_mode<synchronous>, transform_indices = @transform_5, window_bounds = array<i64: 8, 512>}]} {
    %c0 = arith.constant 0 : index
    %c0_0 = arith.constant 0 : index
    %0 = vector.load %arg1[%c0, %c0_0] : memref<8x32xf32, #tpu.memory_space<vmem>>, vector<8x32xf32>
    %c0_1 = arith.constant 0 : index
    %c0_2 = arith.constant 0 : index
    %1 = vector.load %arg2[%c0_1, %c0_2] : memref<8x32xf32, #tpu.memory_space<vmem>>, vector<8x32xf32>
    %2 = arith.minimumf %0, %1 : vector<8x32xf32>
    %3 = math.sin %2 : vector<8x32xf32>
    %c0_3 = arith.constant 0 : index
    %c0_4 = arith.constant 0 : index
    %4 = vector.load %arg5[%c0_3, %c0_4] : memref<8x32xf32, #tpu.memory_space<vmem>>, vector<8x32xf32>
    tpu.vector_store %arg5[%c0_3, %c0_4], %3 {strides = array<i32>} : memref<8x32xf32, #tpu.memory_space<vmem>>, vector<8x32xf32>,
    %c0_5 = arith.constant 0 : index
    %c0_6 = arith.constant 0 : index
    %5 = vector.load %arg3[%c0_5, %c0_6] : memref<32x512xf32, #tpu.memory_space<vmem>>, vector<32x512xf32>
    %cst = arith.constant dense<0.000000e+00> : vector<8x512xf32>
    %6 = tpu.matmul %2, %5, %cst {dimension_numbers = #tpu.dot_dimension_numbers<[1], [0], [0], [1], [0, 0, 1, 1], [], []>} : vector<8x32xf32>, vector<32x512xf32>, vector<8x512xf32> -> vector<8x512xf32>
    %c0_7 = arith.constant 0 : index
    %c0_8 = arith.constant 0 : index
    %7 = vector.load %arg4[%c0_7, %c0_8] : memref<1x512xf32, #tpu.memory_space<vmem>>, vector<1x512xf32>
    %8 = vector.broadcast %7 : vector<1x512xf32> to vector<8x512xf32>
    %9 = arith.addf %6, %8 : vector<8x512xf32>
    %c0_9 = arith.constant 0 : index
    %c0_10 = arith.constant 0 : index
    %10 = vector.load %arg6[%c0_9, %c0_10] : memref<8x512xf32, #tpu.memory_space<vmem>>, vector<8x512xf32>
    tpu.vector_store %arg6[%c0_9, %c0_10], %9 {strides = array<i32>} : memref<8x512xf32, #tpu.memory_space<vmem>>, vector<8x512xf32>,
    return
  }
  func.func @transform_0(%arg0: i32) -> (i32, i32) {
    %c0_i32 = arith.constant 0 : i32
    %c0_i32_0 = arith.constant 0 : i32
    %c0_i32_1 = arith.constant 0 : i32
    return %c0_i32, %c0_i32_0 : i32, i32
  }
  func.func @transform_1(%arg0: i32) -> (i32, i32) {
    %c0_i32 = arith.constant 0 : i32
    %c0_i32_0 = arith.constant 0 : i32
    %c0_i32_1 = arith.constant 0 : i32
    return %c0_i32, %c0_i32_0 : i32, i32
  }
  func.func @transform_2(%arg0: i32) -> (i32, i32) {
    %c0_i32 = arith.constant 0 : i32
    %c0_i32_0 = arith.constant 0 : i32
    %c0_i32_1 = arith.constant 0 : i32
    return %c0_i32, %c0_i32_0 : i32, i32
  }
  func.func @transform_3(%arg0: i32) -> (i32, i32) {
    %c0_i32 = arith.constant 0 : i32
    %c0_i32_0 = arith.constant 0 : i32
    %c0_i32_1 = arith.constant 0 : i32
    return %c0_i32, %c0_i32_0 : i32, i32
  }
  func.func @transform_4(%arg0: i32) -> (i32, i32) {
    %c0_i32 = arith.constant 0 : i32
    %c0_i32_0 = arith.constant 0 : i32
    %c0_i32_1 = arith.constant 0 : i32
    return %c0_i32, %c0_i32_0 : i32, i32
  }
  func.func @transform_5(%arg0: i32) -> (i32, i32) {
    %c0_i32 = arith.constant 0 : i32
    %c0_i32_0 = arith.constant 0 : i32
    %c0_i32_1 = arith.constant 0 : i32
    return %c0_i32, %c0_i32_0 : i32, i32
  }
}

</mosaic_0001>

<bundles_post_ra>
// kernel: forward.1
= control target key start
LH: loop header
LB: loop body
LE: loop exit
PB: predicated region body
PF: predicated region fallthrough
CT: control target
= control target key end

     0   :  { %vm177_vm0 = vcmask 261120   ;;  %v314_v30 = vmov 683565275   ;;  %v315_v32 = vmov 2475754826   ;;  %s478_s2 = inlined_call_operand.vmem [shape: f32[32,512], index: 2, kind: input, shape index: {}]   ;;  %s479_s0 = inlined_call_operand.vmem [shape: f32[8,32], index: 0, kind: input, shape index: {}]   ;;  %s480_s1 = inlined_call_operand.vmem [shape: f32[8,32], index: 1, kind: input, shape index: {}]   ;;  %s481_s4 = inlined_call_operand.vmem [shape: f32[8,32], index: 4, kind: output, shape index: {0}]   ;;  %s482_s3 = inlined_call_operand.vmem [shape: f32[1,512], index: 3, kind: input, shape index: {}]   ;;  %s483_s5 = inlined_call_operand.vmem [shape: f32[8,512], index: 5, kind: output, shape index: {1}]  }
   0x1   :  { %v193_v0 = vld [vmem:[%s478_s2 + $0x70] sm:$0xff]  ;;  %v194_v1 = vld [vmem:[%s478_s2 + $0x78] sm:$0xff]  ;;  %v191_v6 = vld [vmem:[%s478_s2 + $0x60] sm:$0xff]  ;;  %v316_v34 = vmov 2131351028  }
   0x2   :  { %v189_v2 = vld [vmem:[%s478_s2 + $0x50] sm:$0xff]  ;;  %260 = vmatpush.msra.mxu2 %v193_v0  ;;  %280 = vmatpush.msra.mxu3 %v194_v1  ;;  %v190_v3 = vld [vmem:[%s478_s2 + $0x58] sm:$0xff]  ;;  %v192_v7 = vld [vmem:[%s478_s2 + $0x68] sm:$0xff]  ;;  %v317_v36 = vmov 2102212464  }
   0x3   :  { %v185_v4 = vld [vmem:[%s478_s2 + $0x30] sm:$0xff]  ;;  %v186_v5 = vld [vmem:[%s478_s2 + $0x38] sm:$0xff]  ;;  %v19_v9 = vld [vmem:[%s479_s0] sm:$0xff]  ;;  %220 = vmatpush.msra.mxu0 %v191_v6  ;;  %240 = vmatpush.msra.mxu1 %v192_v7  ;;  %v318_v38 = vmov 920167782  }
   0x4   :  { %261 = vmatpush.msra.mxu2 %v189_v2  ;;  %281 = vmatpush.msra.mxu3 %v190_v3  ;;  %v181_v8 = vld [vmem:[%s478_s2 + $0x10] sm:$0xff]  ;;  %v20_v10 = vld [vmem:[%s480_s1] sm:$0xff]  ;;  %v182_v11 = vld [vmem:[%s478_s2 + $0x18] sm:$0xff]  ;;  %v319_v44 = vmov 1326507024  }
   0x5   :  { %v387_v12 = vmin.f32 %v19_v9, %v20_v10  ;;  %v187_v13 = vld [vmem:[%s478_s2 + $0x40] sm:$0xff]  ;;  %v188_v14 = vld [vmem:[%s478_s2 + $0x48] sm:$0xff] }
   0x6   :  { %262 = vmatpush.msra.mxu2 %v185_v4  ;;  %282 = vmatpush.msra.mxu3 %v186_v5  ;;  %v183_v16 = vld [vmem:[%s478_s2 + $0x20] sm:$0xff]  ;;  %v184_v17 = vld [vmem:[%s478_s2 + $0x28] sm:$0xff] }
   0x7   :  { %v25_v15 = vand.u32 2139095040, %v387_v12  ;;  %221 = vmatpush.msra.mxu0 %v187_v13  ;;  %241 = vmatpush.msra.mxu1 %v188_v14  ;;  %v179_v19 = vld [vmem:[%s478_s2] sm:$0xff]  ;;  %v180_v20 = vld [vmem:[%s478_s2 + $0x8] sm:$0xff]  ;;  %v22_v21 = vand.u32 2147483647, %v387_v12  ;;  %vm24_vm13 = vcmp.lt.s32.totalorder %v387_v12, 0 }
   0x8   :  { %263 = vmatpush.msra.mxu2 %v181_v8  ;;  %283 = vmatpush.msra.mxu3 %v182_v11 }
   0x9   :  { %v26_v18 = vshrl.u32 %v25_v15, 23  ;;  %305 = vmatmul.msk.f32.vlgmr.msra.gmra.mxu2 %vm177_vm0, %v387_v12  ;;  %306 = vmatmul.msk.f32.vlgmr.msra.gmra.mxu3 %vm177_vm0, %v387_v12  ;;  %v29_v24 = vand.u32 8388607, %v22_v21  ;;  %vm23_vm14 = vcmp.le.f32.partialorder %v22_v21, 0.7853982 }
   0xa   :  { %222 = vmatpush.msra.mxu0 %v183_v16  ;;  %242 = vmatpush.msra.mxu1 %v184_v17 }
   0xb   :  { %v300_v22 = vadd.s32 4294967169, %v26_v18  ;;  %v30_v27 = vor.u32 8388608, %v29_v24 }
   0xc   :  { %223 = vmatpush.msra.mxu0 %v179_v19  ;;  %243 = vmatpush.msra.mxu1 %v180_v20  ;;  %v320_v19 = vmov 0  }
   0xd   :  { %v32_v23 = vadd.s32 1, %v300_v22  ;;  %303 = vmatmul.msk.f32.vlgmr.msra.gmra.mxu0 %vm177_vm0, %v387_v12  ;;  %304 = vmatmul.msk.f32.vlgmr.msra.gmra.mxu1 %vm177_vm0, %v387_v12  ;;  %v422_v46 = vshll.u32 %v30_v27, 8 }
   0xf   :  { %vm33_vm1 = vcmp.gt.s32.totalorder %v32_v23, 0  ;;  %v71_v58 = vand.u32 65535, %v422_v46  ;;  %v72_v59 = vshrl.u32 %v422_v46, 16 }
  0x10   :  { %v34_v25 = vsel %vm33_vm1, %v32_v23, 0 }
  0x11   :  { %v36_v26 = vand.u32 31, %v34_v25  ;;  %v419_v28 = vshrl.u32 %v34_v25, 5 }
  0x13   :  { %v37_v29 = vsub.s32 32, %v36_v26  ;;  %v39_v31 = vshll.u32 %v314_v30, %v36_v26  ;;  %v42_v33 = vshll.u32 %v315_v32, %v36_v26  ;;  %v45_v35 = vshll.u32 %v316_v34, %v36_v26 }
  0x14   :  { %v48_v37 = vshll.u32 %v317_v36, %v36_v26  ;;  %v51_v39 = vshll.u32 %v318_v38, %v36_v26  ;;  %vm54_vm2 = vcmp.lt.s32.totalorder %v419_v28, 1  ;;  %vm57_vm3 = vcmp.lt.s32.totalorder %v419_v28, 4 }
  0x15   :  { %v40_v40 = vshrl.u32 %v315_v32, %v37_v29  ;;  %v43_v41 = vshrl.u32 %v316_v34, %v37_v29  ;;  %v46_v42 = vshrl.u32 %v317_v36, %v37_v29  ;;  %v49_v43 = vshrl.u32 %v318_v38, %v37_v29 }
  0x16   :  { %v52_v45 = vshrl.u32 %v319_v44, %v37_v29  ;;  %vm56_vm4 = vcmp.lt.s32.totalorder %v419_v28, 3  ;;  %vm55_vm5 = vcmp.lt.s32.totalorder %v419_v28, 2  ;;  %v38_v2 = vshrl.u32 %v314_v30, %v37_v29 }
  0x17   :  { %v41_v47 = vor.u32 %v40_v40, %v39_v31  ;;  %v44_v48 = vor.u32 %v43_v41, %v42_v33  ;;  %v47_v49 = vor.u32 %v46_v42, %v45_v35  ;;  %v50_v50 = vor.u32 %v49_v43, %v48_v37 }
  0x18   :  { %v53_v51 = vor.u32 %v52_v45, %v51_v39 }
  0x19   :  { %v62_v52 = vsel %vm54_vm2, %v41_v47, %v44_v48  ;;  %v66_v53 = vsel %vm54_vm2, %v44_v48, %v47_v49  ;;  %v63_v54 = vsel %vm57_vm3, %v50_v50, 920167782  ;;  %v58_v16 = vsel %vm54_vm2, %v38_v2, %v41_v47 }
  0x1a   :  { %v67_v55 = vsel %vm57_vm3, %v53_v51, 1326507024  ;;  %v64_v56 = vsel %vm56_vm4, %v47_v49, %v63_v54  ;;  %v59_v18 = vsel %vm57_vm3, %v47_v49, 2102212464  ;;  %vm165_vm3 = vweird.f32 %v387_v12 }
  0x1b   :  { %v68_v57 = vsel %vm56_vm4, %v50_v50, %v67_v55  ;;  %v65_v60 = vsel %vm55_vm5, %v62_v52, %v64_v56  ;;  %v60_v30 = vsel %vm56_vm4, %v44_v48, %v59_v18 }
  0x1c   :  { %v69_v61 = vsel %vm55_vm5, %v66_v53, %v68_v57  ;;  %v95_v0 = vand.u32 65535, %v65_v60  ;;  %v96_v1 = vshrl.u32 %v65_v60, 16  ;;  %v61_v38 = vsel %vm55_vm5, %v58_v16, %v60_v30 }
  0x1d   :  { %v73_v62 = vand.u32 65535, %v69_v61  ;;  %v74_v63 = vshrl.u32 %v69_v61, 16  ;;  %v115_v42 = vmul.u32 %v422_v46, %v61_v38 }
  0x1e   :  { %v97_v6 = vmul.u32 %v95_v0, %v71_v58  ;;  %v98_v7 = vmul.u32 %v96_v1, %v71_v58  ;;  %v99_v8 = vmul.u32 %v95_v0, %v72_v59  ;;  %v100_v13 = vmul.u32 %v96_v1, %v72_v59 }
  0x1f   :  { %v75_v3 = vmul.u32 %v73_v62, %v71_v58  ;;  %v76_v4 = vmul.u32 %v74_v63, %v71_v58  ;;  %v77_v5 = vmul.u32 %v73_v62, %v72_v59  ;;  %v78_v9 = vmul.u32 %v74_v63, %v72_v59 }
  0x20   :  { %v101_v14 = vshll.u32 %v98_v7, 16  ;;  %v103_v15 = vshll.u32 %v99_v8, 16  ;;  %v102_v27 = vshrl.u32 %v98_v7, 16  ;;  %v104_v34 = vshrl.u32 %v99_v8, 16 }
  0x21   :  { %v79_v10 = vshll.u32 %v76_v4, 16  ;;  %v81_v11 = vshll.u32 %v77_v5, 16  ;;  %v80_v23 = vshrl.u32 %v76_v4, 16  ;;  %v82_v31 = vshrl.u32 %v77_v5, 16 }
  0x22   :  { %vm105_vm7 = vc.u32 %v97_v6, %v101_v14  ;;  %v107_v22 = vadd.s32 %v101_v14, %v97_v6 }
  0x23   :  { %vm83_vm6 = vc.u32 %v75_v3, %v79_v10  ;;  %v85_v17 = vadd.s32 %v79_v10, %v75_v3  ;;  %v106_v25 = vsel %vm105_vm7, 1, %v320_v19 }
  0x24   :  { %v84_v20 = vsel %vm83_vm6, 1, %v320_v19  ;;  %v108_v29 = vadd.s32 %v106_v25, %v100_v13  ;;  %vm109_vm9 = vc.u32 %v107_v22, %v103_v15  ;;  %v111_v37 = vadd.s32 %v107_v22, %v103_v15 }
  0x25   :  { %v86_v24 = vadd.s32 %v84_v20, %v78_v9  ;;  %vm87_vm8 = vc.u32 %v85_v17, %v81_v11  ;;  %v110_v33 = vsel %vm109_vm9, 1, %v320_v19 }
  0x26   :  { %v88_v26 = vsel %vm87_vm8, 1, %v320_v19  ;;  %v112_v35 = vadd.s32 %v110_v33, %v108_v29 }
  0x27   :  { %v90_v32 = vadd.s32 %v88_v26, %v86_v24 }
  0x28   :  { %v113_v39 = vadd.s32 %v112_v35, %v102_v27 }
  0x29   :  { %v91_v36 = vadd.s32 %v90_v32, %v80_v23  ;;  %v195_v32 = vld [vmem:[%s482_s3] sm:$0xf] }
  0x2a   :  { %v114_v41 = vadd.s32 %v113_v39, %v104_v34  ;;  %v197_v33 = vperm.slane %v195_v32, 0  ;;  %v198_v34 = vperm.slane %v195_v32, 1  ;;  %v199_v35 = vperm.slane %v195_v32, 2 }
  0x2b   :  { %v92_v40 = vadd.s32 %v91_v36, %v82_v31  ;;  %v200_v36 = vperm.slane %v195_v32, 3 }
  0x2c   :  { %v118_v43 = vadd.s32 1, %v114_v41 }
  0x2d   :  { %vm117_vm10 = vc.u32 %v92_v40, %v111_v37  ;;  %v116_v28 = vadd.s32 %v111_v37, %v92_v40 }
  0x2e   :  { %v119_v44 = vsel %vm117_vm10, %v118_v43, %v114_v41 }
  0x2f   :  { %v120_v45 = vadd.s32 %v119_v44, %v115_v42 }
  0x31   :  { %v121_v47 = vadd.s32 536870912, %v120_v45 }
  0x33   :  { %v122_v48 = vshrl.u32 %v121_v47, 30 }
  0x35   :  { %v123_v49 = vshll.u32 %v122_v48, 30  ;;  %v146_v2 = vsub.s32 4, %v122_v48 }
  0x37   :  { %v124_v50 = vsub.s32 %v120_v45, %v123_v49  ;;  %v147_v5 = vsel %vm24_vm13, %v146_v2, %v122_v48 }
  0x38   :  { %v149_v8 = vsel %vm23_vm14, 0, %v147_v5 }
  0x39   :  { %vm125_vm11 = vcmp.lt.s32.totalorder %v124_v50, 0  ;;  %v126_v51 = vsub.s32 0, %v124_v50  ;;  %v166_v14 = vadd.s32 3, %v149_v8 }
  0x3b   :  { %v127_v52 = vsel %vm125_vm11, %v126_v51, %v124_v50  ;;  %v167_v19 = vand.u32 3, %v166_v14 }
  0x3c   :  { %v128_v53 = vclz %v127_v52 }
  0x3d   :  { %vm172_vm15 = vcmp.eq.s32.totalorder %v167_v19, 2  ;;  %vm169_vm1 = vcmp.eq.s32.totalorder %v167_v19, 0  ;;  %vm168_vm2 = vcmp.lt.s32.totalorder %v167_v19, 2 }
  0x3e   :  { %v301_v54 = vadd.s32 4294967294, %v128_v53 }
  0x40   :  { %vm302_vm12 = vcmp.lt.s32.totalorder %v301_v54, 0 }
  0x41   :  { %v131_v55 = vsel %vm302_vm12, 0, %v301_v54 }
  0x42   :  { %v132_v56 = vsub.s32 32, %v131_v55  ;;  %v133_v57 = vshll.u32 %v124_v50, %v131_v55  ;;  %v136_v58 = vsub.s32 4294967266, %v131_v55 }
  0x44   :  { %v134_v46 = vshrl.u32 %v116_v28, %v132_v56  ;;  %v137_v59 = vadd.s32 127, %v136_v58 }
  0x46   :  { %v135_v60 = vor.u32 %v134_v46, %v133_v57  ;;  %v138_v61 = vshll.u32 %v137_v59, 23 }
  0x48   :  { %v139_v62 = vor.u32 4788187, %v138_v61  ;;  %v142_v63 = vcvt.s32.f32 %v135_v60 }
  0x4a   :  { %v140_v0 = vand.u32 2147483647, %v139_v62 }
  0x4c   :  { %v143_v1 = vmul.f32 %v142_v63, %v140_v0 }
  0x4e   :  { %v144_v3 = vxor.u32 2147483648, %v143_v1 }
  0x50   :  { %v145_v4 = vsel %vm24_vm13, %v144_v3, %v143_v1 }
  0x51   :  { %v148_v6 = vsel %vm23_vm14, %v387_v12, %v145_v4 }
  0x52   :  { %v150_v7 = vmul.f32 %v148_v6, %v148_v6 }
  0x54   :  { %v151_v9 = vmul.f32 -0.001358992, %v150_v7  ;;  %v158_v10 = vmul.f32 -0.00019511016, %v150_v7 }
  0x56   :  { %v152_v11 = vadd.f32 0.041655596, %v151_v9  ;;  %v159_v13 = vadd.f32 0.008332121, %v158_v10 }
  0x58   :  { %v153_v15 = vmul.f32 %v152_v11, %v150_v7  ;;  %v160_v16 = vmul.f32 %v159_v13, %v150_v7 }
  0x5a   :  { %v154_v17 = vadd.f32 -0.4999988, %v153_v15  ;;  %v161_v18 = vadd.f32 -0.16666654, %v160_v16 }
  0x5c   :  { %v155_v20 = vmul.f32 %v154_v17, %v150_v7  ;;  %v162_v22 = vmul.f32 %v161_v18, %v150_v7 }
  0x5e   :  { %v156_v21 = vadd.f32 1.0, %v155_v20  ;;  %v163_v23 = vadd.f32 1.0, %v162_v22 }
  0x60   :  { %v164_v24 = vmul.f32 %v163_v23, %v148_v6  ;;  %v173_v25 = vxor.u32 2147483648, %v156_v21 }
  0x62   :  { %v170_v26 = vxor.u32 2147483648, %v164_v24  ;;  %v174_v27 = vsel %vm172_vm15, %v173_v25, %v164_v24 }
  0x64   :  { %v171_v29 = vsel %vm169_vm1, %v156_v21, %v170_v26 }
  0x65   :  { %v175_v30 = vsel %vm168_vm2, %v171_v29, %v174_v27 }
  0x66   :  { %v176_v31 = vsel %vm165_vm3, nan, %v175_v30 }
  0x67   :  { %178 = vst.msk [vmem:[%s481_s4] sm:$0xff] %vm177_vm0, %v176_v31 }
  0x8a   :  { %v225_v37 = vpop.f32.mrf.mxu0  ;;  %v245_v38 = vpop.f32.mrf.mxu1 }
  0x8b   :  { %v226_v39 = vadd.f32 %v225_v37, %v197_v33  ;;  %v246_v12 = vadd.f32 %v245_v38, %v198_v34 }
  0x8c   :  { %v265_v40 = vpop.f32.mrf.mxu2  ;;  %v285_v41 = vpop.f32.mrf.mxu3 }
  0x8d   :  { %288 = vst [vmem:[%s483_s5] sm:$0xff] %v226_v39  ;;  %v266_v42 = vadd.f32 %v265_v40, %v199_v35  ;;  %v286_v43 = vadd.f32 %v285_v41, %v200_v36 }
  0x8e   :  { %289 = vst [vmem:[%s483_s5 + $0x8] sm:$0xff] %v246_v12 }
  0x8f   :  { %290 = vst [vmem:[%s483_s5 + $0x10] sm:$0xff] %v266_v42 }
  0x90   :  { %291 = vst [vmem:[%s483_s5 + $0x18] sm:$0xff] %v286_v43 }

</bundles_post_ra>
